<compile_context>
chip_gen: v5e
topology: v5e:2x2
jax: 0.10.0
libtpu: 0.0.40
codegen_flags: <defaults>
</compile_context>

<pallas_src>
import jax
import jax.numpy as jnp
from jax.experimental import pallas as pl
from jax.experimental.pallas import tpu as pltpu


def _round_up(n, m):
    return ((n + m - 1) // m) * m


def _tpu_vmem_bytes():
    """Best-effort physical VMEM query; conservative fallback (v7x per-TC)."""
    try:
        return pltpu.get_tpu_info().vmem_capacity_bytes
    except Exception:
        return 64 << 20


def _pick_tile(batch, bm):
    """Clamp/align the row tile; for multi-step grids prefer an even number of
    grid steps so both v7x TensorCores get work under 'parallel' semantics."""
    bm = min(bm, batch)
    if bm >= batch:
        return batch, 1
    bm = max(8, (bm // 8) * 8)                 # sublane-aligned tile
    n = pl.cdiv(batch, bm)
    if n > 1 and n % 2 == 1:                   # make the grid count even (>=2)
        bm = max(8, _round_up(pl.cdiv(batch, n + 1), 8))
        n = pl.cdiv(batch, bm)
    return bm, n


def _linear_kernel(x_ref, wt_ref, b_ref, o_ref):
    # x_ref: [bm, F] (bf16 or f32), wt_ref: [F, Cp] bf16, b_ref: [1, Cp] f32,
    # o_ref: [bm, Cp] f32.  Plain A@B on the MXU with f32 accumulation.
    acc = jnp.dot(
        x_ref[...].astype(jnp.bfloat16),       # no-op when activations are bf16
        wt_ref[...],
        preferred_element_type=jnp.float32,
    )
    o_ref[...] = (acc + b_ref[...]).astype(o_ref.dtype)


def classifier_forward(x, w_t, b, num_classes, *, bm=None):
    """Pallas linear head: (x[B,F] @ w_t[F,Cp] + b[1,Cp])[:, :num_classes]."""
    B, F = x.shape
    Fw, Cp = w_t.shape
    assert F == Fw and b.shape == (1, Cp) and Cp % 128 == 0

    big_vmem = _tpu_vmem_bytes() >= (100 << 20)   # v5e / v6e: 128 MiB physical
    if bm is None:
        bm = 1024 if big_vmem else 512            # v7x: cap the row tile at 512
    bm, grid_n = _pick_tile(B, bm)

    # Raise the scoped-VMEM limit only where the big tiles need it (v5e default
    # is 16 MiB, v6e 32 MiB); sized from the actual double-buffered working set
    # and capped so it is safe even if the hardware query misreports.
    if big_vmem:
        need = (2 * bm * F * x.dtype.itemsize          # x tiles (double-buffered)
                + 2 * F * Cp * w_t.dtype.itemsize      # weight buffers
                + 2 * bm * Cp * 4                      # output tiles
                + (8 << 20))                           # headroom
        vmem_limit = min(_round_up(need, 1 << 20), 100 << 20)
    else:
        vmem_limit = None

    out = pl.pallas_call(
        _linear_kernel,
        out_shape=jax.ShapeDtypeStruct((B, Cp), jnp.float32),
        grid_spec=pltpu.PrefetchScalarGridSpec(
            num_scalar_prefetch=0,
            grid=(grid_n,),
            in_specs=[
                pl.BlockSpec((bm, F), lambda i: (i, 0)),   # x row tile (pipelined)
                pl.BlockSpec((F, Cp), lambda i: (0, 0)),   # weight, grid-invariant
                pl.BlockSpec((1, Cp), lambda i: (0, 0)),   # bias, grid-invariant
            ],
            out_specs=pl.BlockSpec((bm, Cp), lambda i: (i, 0)),
        ),
        compiler_params=pltpu.CompilerParams(
            dimension_semantics=("parallel",),             # rows are independent
            vmem_limit_bytes=vmem_limit,
        ),
        cost_estimate=pl.CostEstimate(
            flops=2 * B * F * Cp,
            transcendentals=0,
            bytes_accessed=(B * F * x.dtype.itemsize
                            + F * Cp * w_t.dtype.itemsize
                            + B * Cp * 4),
        ),
    )(x, w_t, b)
    return out[:, :num_classes]


class BaseClassifierNetPallas:
    """JAX/Pallas equivalent of BaseClassifierNet (VGG13 variant: feature_len=4096)."""

    def __init__(self, feature_len=4096, num_classes=40, key=jax.random.PRNGKey(0)):
        self.feature_len = feature_len
        self.num_classes = num_classes
        self.padded_classes = _round_up(num_classes, 128)   # lane-dense output
        k_w, k_b = jax.random.split(key)
        # nn.Linear default init: uniform(-1/sqrt(F), 1/sqrt(F)).
        bound = 1.0 / jnp.sqrt(jnp.float32(feature_len))
        w = jax.random.uniform(k_w, (num_classes, feature_len), dtype=jnp.float32,
                               minval=-bound, maxval=bound)
        bias = jax.random.uniform(k_b, (num_classes,), dtype=jnp.float32,
                                  minval=-bound, maxval=bound)
        # Pre-transposed, zero-padded [K, N] = [F, C_pad] bf16 weight.
        w_t = jnp.zeros((feature_len, self.padded_classes), dtype=jnp.bfloat16)
        self.w_t = w_t.at[:, :num_classes].set(w.T.astype(jnp.bfloat16))
        # Zero-padded bias (padded lanes must stay zero; output is sliced anyway).
        b_pad = jnp.zeros((1, self.padded_classes), dtype=jnp.float32)
        self.b = b_pad.at[:, :num_classes].set(bias)

    def __call__(self, x):
        return classifier_forward(x, self.w_t, self.b, self.num_classes)


if __name__ == "__main__":
    key = jax.random.PRNGKey(0)
    k_x, k_params = jax.random.split(key)

    batch = 8
    feature_len = 4096   # VGG13 branch of the module
    num_classes = 40

    model = BaseClassifierNetPallas(feature_len, num_classes, key=k_params)

    x_f32 = jax.random.normal(k_x, (batch, feature_len), dtype=jnp.float32)
    # Recommended calling convention: bf16 activations (upstream feature
    # extractor would emit bf16); the kernel also accepts f32.
    x = x_f32.astype(jnp.bfloat16)

    out = jax.block_until_ready(model(x))
    assert out.shape == (batch, num_classes)

    # Pure-JAX reference using exactly the bf16 values the kernel sees.
    w_eff = model.w_t[:, :num_classes].astype(jnp.float32)
    ref = x.astype(jnp.float32) @ w_eff + model.b[:, :num_classes]
    assert jnp.allclose(out, ref, atol=1e-2, rtol=1e-2), "mismatch vs reference"

    print("KERNEL_OK")
</pallas_src>

<mosaic_0001>
module attributes {stable_mosaic.version = 11 : i64} {
  func.func @_linear_kernel(%arg0: i32, %arg1: memref<8x4096xbf16, #tpu.memory_space<vmem>>, %arg2: memref<4096x128xbf16, #tpu.memory_space<vmem>>, %arg3: memref<1x128xf32, #tpu.memory_space<vmem>>, %arg4: memref<8x128xf32, #tpu.memory_space<vmem>>) attributes {dimension_semantics = [#tpu.dimension_semantics<parallel>], iteration_bounds = array<i64: 1>, scalar_prefetch = 0 : i64, scratch_operands = 0 : i64, tpu.core_type = #tpu.core_type<tc>, window_params = [{transform_indices = @transform_0, window_bounds = array<i64: 8, 4096>}, {pipeline_mode = #tpu.pipeline_mode<synchronous>, transform_indices = @transform_1, window_bounds = array<i64: 4096, 128>}, {pipeline_mode = #tpu.pipeline_mode<synchronous>, transform_indices = @transform_2, window_bounds = array<i64: 1, 128>}, {transform_indices = @transform_3, window_bounds = array<i64: 8, 128>}]} {
    %c0 = arith.constant 0 : index
    %c0_0 = arith.constant 0 : index
    %0 = vector.load %arg1[%c0, %c0_0] : memref<8x4096xbf16, #tpu.memory_space<vmem>>, vector<8x4096xbf16>
    %c0_1 = arith.constant 0 : index
    %c0_2 = arith.constant 0 : index
    %1 = vector.load %arg2[%c0_1, %c0_2] : memref<4096x128xbf16, #tpu.memory_space<vmem>>, vector<4096x128xbf16>
    %cst = arith.constant dense<0.000000e+00> : vector<8x128xf32>
    %2 = tpu.matmul %0, %1, %cst {dimension_numbers = #tpu.dot_dimension_numbers<[1], [0], [0], [1], [0, 0, 1, 1], [], []>} : vector<8x4096xbf16>, vector<4096x128xbf16>, vector<8x128xf32> -> vector<8x128xf32>
    %c0_3 = arith.constant 0 : index
    %c0_4 = arith.constant 0 : index
    %3 = vector.load %arg3[%c0_3, %c0_4] : memref<1x128xf32, #tpu.memory_space<vmem>>, vector<1x128xf32>
    %4 = vector.broadcast %3 : vector<1x128xf32> to vector<8x128xf32>
    %5 = arith.addf %2, %4 : vector<8x128xf32>
    %c0_5 = arith.constant 0 : index
    %c0_6 = arith.constant 0 : index
    %6 = vector.load %arg4[%c0_5, %c0_6] : memref<8x128xf32, #tpu.memory_space<vmem>>, vector<8x128xf32>
    tpu.vector_store %arg4[%c0_5, %c0_6], %5 {strides = array<i32>} : memref<8x128xf32, #tpu.memory_space<vmem>>, vector<8x128xf32>,
    return
  }
  func.func @transform_0(%arg0: i32) -> (i32, i32) {
    %c0_i32 = arith.constant 0 : i32
    %c0_i32_0 = arith.constant 0 : i32
    return %arg0, %c0_i32 : i32, i32
  }
  func.func @transform_1(%arg0: i32) -> (i32, i32) {
    %c0_i32 = arith.constant 0 : i32
    %c0_i32_0 = arith.constant 0 : i32
    %c0_i32_1 = arith.constant 0 : i32
    return %c0_i32, %c0_i32_0 : i32, i32
  }
  func.func @transform_2(%arg0: i32) -> (i32, i32) {
    %c0_i32 = arith.constant 0 : i32
    %c0_i32_0 = arith.constant 0 : i32
    %c0_i32_1 = arith.constant 0 : i32
    return %c0_i32, %c0_i32_0 : i32, i32
  }
  func.func @transform_3(%arg0: i32) -> (i32, i32) {
    %c0_i32 = arith.constant 0 : i32
    %c0_i32_0 = arith.constant 0 : i32
    return %arg0, %c0_i32 : i32, i32
  }
}

</mosaic_0001>

<bundles_post_ra>
// kernel: tpu_custom_call.1
= control target key start
LH: loop header
LB: loop body
LE: loop exit
PB: predicated region body
PF: predicated region fallthrough
CT: control target
= control target key end

     0   :  { %8 = vsyncpa [#allocation3], 0  ;;  %s4067_s0 = inlined_call_operand.hbm [shape: bf16[8,4096], index: 0, kind: input, shape index: {}]   ;;  %s4068_s1 = inlined_call_operand.hbm [shape: bf16[4096,128], index: 1, kind: input, shape index: {}]   ;;  %s4069_s2 = inlined_call_operand.vmem [shape: f32[1,128], index: 2, kind: input, shape index: {}]   ;;  %s4070_s3 = inlined_call_operand.hbm [shape: f32[8,128], index: 3, kind: output, shape index: {}]  }
   0x1   :  { %9 = vsyncpa [#allocation6], 0 }
   0x2   :  { %10 = vsyncpa [#allocation4], 0  ;;  %s16_s14 = sshll.u32 %s4067_s0, 4  ;;  %s4024_s15 = smov [#allocation2]   ;;  %s17_s14 = int_to_ptr.hbm [resolvable:$true] %s16_s14 }
   0x3   :  { %s18_s16 = sshll.u32 %s4024_s15, 4  ;;  %s26_s19 = sshll.u32 %s4068_s1, 4  ;;  %s19_s16 = int_to_ptr.vmem [resolvable:$true] %s18_s16  ;;  %s27_s19 = int_to_ptr.hbm [resolvable:$true] %s26_s19 }
   0x4   :  { %21 = dma.hbm_to_vmem [thread:$0]  %s17_s14, 2048, %s19_s16, [#allocation3]  }
   0x5   :  { %s4025_s20 = smov [#allocation5]   ;;  %s4026_s22 = smov 64  }
   0x6   :  { %s28_s21 = sshll.u32 %s4025_s20, 4  ;;  %s4027_s23 = smov 4   ;;  %s29_s21 = int_to_ptr.vmem [resolvable:$true] %s28_s21 }
   0x7   :  { %34 = dma.hbm_to_vmem [thread:$0]  %s27_s19, 32768, %s29_s21, [#allocation6], %s4026_s22, %s4026_s22, %s4027_s23  }
   0x8   :  { %4018 = dma.done.wait [#allocation3], 2048  }
   0x9   :  { %4019 = vsyncadd [#allocation3], 4294965248 }
   0xa   :  { %4020 = dma.done.wait [#allocation6], 32768  }
   0xb   :  { %4021 = vsyncadd [#allocation6], 4294934528  ;;  %v3691_v0 = vld [vmem:[#allocation5 + $0x38] sm:$0xff]  ;;  %v3690_v4 = vld [vmem:[#allocation5 + $0x30] sm:$0xff]  ;;  %s2649_s27 = sshll.u32 %s4070_s3, 4  ;;  %s2650_s27 = int_to_ptr.hbm [resolvable:$true] %s2649_s27 }
   0xc   :  { %v3699_v1 = vld [vmem:[#allocation5 + $0x78] sm:$0xff]  ;;  %2225 = vmatpush.bf16.msra.mxu0 %v3691_v0  ;;  %v3698_v5 = vld [vmem:[#allocation5 + $0x70] sm:$0xff]  ;;  %v3689_v8 = vld [vmem:[#allocation5 + $0x28] sm:$0xff] }
   0xd   :  { %v3707_v2 = vld [vmem:[#allocation5 + $0xb8] sm:$0xff]  ;;  %2238 = vmatpush.bf16.msra.mxu1 %v3699_v1  ;;  %v3706_v6 = vld [vmem:[#allocation5 + $0xb0] sm:$0xff]  ;;  %v3697_v9 = vld [vmem:[#allocation5 + $0x68] sm:$0xff] }
   0xe   :  { %v3715_v3 = vld [vmem:[#allocation5 + $0xf8] sm:$0xff]  ;;  %2251 = vmatpush.bf16.msra.mxu2 %v3707_v2  ;;  %v3714_v7 = vld [vmem:[#allocation5 + $0xf0] sm:$0xff]  ;;  %v3705_v10 = vld [vmem:[#allocation5 + $0xa8] sm:$0xff] }
   0xf   :  { %2264 = vmatpush.bf16.msra.mxu3 %v3715_v3  ;;  %v3713_v11 = vld [vmem:[#allocation5 + $0xe8] sm:$0xff]  ;;  %v3688_v12 = vld [vmem:[#allocation5 + $0x20] sm:$0xff]  ;;  %v3687_v16 = vld [vmem:[#allocation5 + $0x18] sm:$0xff] }
  0x10   :  { %2226 = vmatpush.bf16.msra.mxu0 %v3690_v4  ;;  %v3696_v13 = vld [vmem:[#allocation5 + $0x60] sm:$0xff]  ;;  %v3695_v17 = vld [vmem:[#allocation5 + $0x58] sm:$0xff]  ;;  %v3686_v20 = vld [vmem:[#allocation5 + $0x10] sm:$0xff] }
  0x11   :  { %2239 = vmatpush.bf16.msra.mxu1 %v3698_v5  ;;  %v3704_v14 = vld [vmem:[#allocation5 + $0xa0] sm:$0xff]  ;;  %v3703_v18 = vld [vmem:[#allocation5 + $0x98] sm:$0xff]  ;;  %v3694_v21 = vld [vmem:[#allocation5 + $0x50] sm:$0xff] }
  0x12   :  { %2252 = vmatpush.bf16.msra.mxu2 %v3706_v6  ;;  %v3712_v15 = vld [vmem:[#allocation5 + $0xe0] sm:$0xff]  ;;  %v3711_v19 = vld [vmem:[#allocation5 + $0xd8] sm:$0xff]  ;;  %v3702_v22 = vld [vmem:[#allocation5 + $0x90] sm:$0xff] }
  0x13   :  { %2265 = vmatpush.bf16.msra.mxu3 %v3714_v7  ;;  %v3710_v23 = vld [vmem:[#allocation5 + $0xd0] sm:$0xff]  ;;  %v3685_v24 = vld [vmem:[#allocation5 + $0x8] sm:$0xff]  ;;  %v45_v29 = vld [vmem:[#allocation2] sm:$0xff] }
  0x14   :  { %2227 = vmatpush.bf16.msra.mxu0 %v3689_v8  ;;  %v3693_v25 = vld [vmem:[#allocation5 + $0x48] sm:$0xff]  ;;  %v3684_v30 = vld [vmem:[#allocation5] sm:$0xff]  ;;  %v593_v33 = vunpack.c.l.b16 %v45_v29  ;;  %v594_v37 = vunpack.c.h.b16 %v45_v29  ;;  %v3723_v38 = vld [vmem:[#allocation5 + $0x138] sm:$0xff] }
  0x15   :  { %2240 = vmatpush.bf16.msra.mxu1 %v3697_v9  ;;  %v3701_v26 = vld [vmem:[#allocation5 + $0x88] sm:$0xff]  ;;  %v3692_v31 = vld [vmem:[#allocation5 + $0x40] sm:$0xff]  ;;  %v3731_v39 = vld [vmem:[#allocation5 + $0x178] sm:$0xff] }
  0x16   :  { %2253 = vmatpush.bf16.msra.mxu2 %v3705_v10  ;;  %v3709_v27 = vld [vmem:[#allocation5 + $0xc8] sm:$0xff]  ;;  %v3700_v34 = vld [vmem:[#allocation5 + $0x80] sm:$0xff]  ;;  %v3739_v40 = vld [vmem:[#allocation5 + $0x1b8] sm:$0xff]  ;;  %v625_v43 = vpack.c.b16 %v593_v33, %v593_v33  ;;  %v626_v45 = vpack.c.b16 %v594_v37, %v594_v37 }
  0x17   :  { %2266 = vmatpush.bf16.msra.mxu3 %v3713_v11  ;;  %v46_v28 = vld [vmem:[#allocation2 + $0x8] sm:$0xff]  ;;  %v3708_v35 = vld [vmem:[#allocation5 + $0xc0] sm:$0xff]  ;;  %v3747_v41 = vld [vmem:[#allocation5 + $0x1f8] sm:$0xff] }
  0x18   :  { %2228 = vmatpush.bf16.msra.mxu0 %v3688_v12  ;;  %v595_v32 = vunpack.c.l.b16 %v46_v28  ;;  %v596_v36 = vunpack.c.h.b16 %v46_v28  ;;  %v3722_v46 = vld [vmem:[#allocation5 + $0x130] sm:$0xff]  ;;  %v3721_v50 = vld [vmem:[#allocation5 + $0x128] sm:$0xff]  ;;  %v3720_v54 = vld [vmem:[#allocation5 + $0x120] sm:$0xff] }
  0x19   :  { %2241 = vmatpush.bf16.msra.mxu1 %v3696_v13  ;;  %v3730_v47 = vld [vmem:[#allocation5 + $0x170] sm:$0xff]  ;;  %v3729_v51 = vld [vmem:[#allocation5 + $0x168] sm:$0xff]  ;;  %v3728_v55 = vld [vmem:[#allocation5 + $0x160] sm:$0xff] }
  0x1a   :  { %2254 = vmatpush.bf16.msra.mxu2 %v3704_v14  ;;  %v627_v42 = vpack.c.b16 %v595_v32, %v595_v32  ;;  %v628_v44 = vpack.c.b16 %v596_v36, %v596_v36  ;;  %v3738_v48 = vld [vmem:[#allocation5 + $0x1b0] sm:$0xff]  ;;  %v3737_v52 = vld [vmem:[#allocation5 + $0x1a8] sm:$0xff]  ;;  %v3736_v56 = vld [vmem:[#allocation5 + $0x1a0] sm:$0xff] }
  0x1b   :  { %2267 = vmatpush.bf16.msra.mxu3 %v3712_v15  ;;  %v3746_v49 = vld [vmem:[#allocation5 + $0x1f0] sm:$0xff]  ;;  %v3745_v53 = vld [vmem:[#allocation5 + $0x1e8] sm:$0xff]  ;;  %v3744_v57 = vld [vmem:[#allocation5 + $0x1e0] sm:$0xff] }
  0x1c   :  { %2229 = vmatpush.bf16.msra.mxu0 %v3687_v16  ;;  %v3719_v58 = vld [vmem:[#allocation5 + $0x118] sm:$0xff]  ;;  %v3718_v62 = vld [vmem:[#allocation5 + $0x110] sm:$0xff]  ;;  %v3717_v2 = vld [vmem:[#allocation5 + $0x108] sm:$0xff] }
  0x1d   :  { %2242 = vmatpush.bf16.msra.mxu1 %v3695_v17  ;;  %v3727_v59 = vld [vmem:[#allocation5 + $0x158] sm:$0xff]  ;;  %v3726_v63 = vld [vmem:[#allocation5 + $0x150] sm:$0xff]  ;;  %v3725_v3 = vld [vmem:[#allocation5 + $0x148] sm:$0xff] }
  0x1e   :  { %2255 = vmatpush.bf16.msra.mxu2 %v3703_v18  ;;  %v3735_v60 = vld [vmem:[#allocation5 + $0x198] sm:$0xff]  ;;  %v3734_v0 = vld [vmem:[#allocation5 + $0x190] sm:$0xff]  ;;  %v3733_v4 = vld [vmem:[#allocation5 + $0x188] sm:$0xff] }
  0x1f   :  { %2268 = vmatpush.bf16.msra.mxu3 %v3711_v19  ;;  %v3743_v61 = vld [vmem:[#allocation5 + $0x1d8] sm:$0xff]  ;;  %v3742_v1 = vld [vmem:[#allocation5 + $0x1d0] sm:$0xff]  ;;  %v3741_v5 = vld [vmem:[#allocation5 + $0x1c8] sm:$0xff] }
  0x20   :  { %2230 = vmatpush.bf16.msra.mxu0 %v3686_v20  ;;  %v48_v6 = vld [vmem:[#allocation2 + $0x18] sm:$0xff]  ;;  %v47_v7 = vld [vmem:[#allocation2 + $0x10] sm:$0xff]  ;;  %v3716_v8 = vld [vmem:[#allocation5 + $0x100] sm:$0xff] }
  0x21   :  { %2243 = vmatpush.bf16.msra.mxu1 %v3694_v21  ;;  %v3724_v9 = vld [vmem:[#allocation5 + $0x140] sm:$0xff]  ;;  %v599_v10 = vunpack.c.l.b16 %v48_v6  ;;  %v597_v11 = vunpack.c.l.b16 %v47_v7  ;;  %v600_v14 = vunpack.c.h.b16 %v48_v6  ;;  %v598_v15 = vunpack.c.h.b16 %v47_v7  ;;  %v3755_v16 = vld [vmem:[#allocation5 + $0x238] sm:$0xff]  ;;  %v3753_v28 = vld [vmem:[#allocation5 + $0x228] sm:$0xff] }
  0x22   :  { %2256 = vmatpush.bf16.msra.mxu2 %v3702_v22  ;;  %v3732_v12 = vld [vmem:[#allocation5 + $0x180] sm:$0xff]  ;;  %v3763_v17 = vld [vmem:[#allocation5 + $0x278] sm:$0xff]  ;;  %v3761_v29 = vld [vmem:[#allocation5 + $0x268] sm:$0xff] }
  0x23   :  { %2269 = vmatpush.bf16.msra.mxu3 %v3710_v23  ;;  %v3740_v13 = vld [vmem:[#allocation5 + $0x1c0] sm:$0xff]  ;;  %v3771_v18 = vld [vmem:[#allocation5 + $0x2b8] sm:$0xff]  ;;  %v631_v20 = vpack.c.b16 %v599_v10, %v599_v10  ;;  %v629_v21 = vpack.c.b16 %v597_v11, %v597_v11  ;;  %v632_v22 = vpack.c.b16 %v600_v14, %v600_v14  ;;  %v630_v23 = vpack.c.b16 %v598_v15, %v598_v15  ;;  %v3785_v6 = vld [vmem:[#allocation5 + $0x328] sm:$0xff] }
  0x24   :  { %2231 = vmatpush.bf16.msra.mxu0 %v3685_v24  ;;  %v3779_v19 = vld [vmem:[#allocation5 + $0x2f8] sm:$0xff]  ;;  %v3754_v24 = vld [vmem:[#allocation5 + $0x230] sm:$0xff]  ;;  %v3752_v32 = vld [vmem:[#allocation5 + $0x220] sm:$0xff] }
  0x25   :  { %2244 = vmatpush.bf16.msra.mxu1 %v3693_v25  ;;  %v3762_v25 = vld [vmem:[#allocation5 + $0x270] sm:$0xff]  ;;  %v3760_v33 = vld [vmem:[#allocation5 + $0x260] sm:$0xff]  ;;  %v3751_v36 = vld [vmem:[#allocation5 + $0x218] sm:$0xff] }
  0x26   :  { %2257 = vmatpush.bf16.msra.mxu2 %v3701_v26  ;;  %v3770_v26 = vld [vmem:[#allocation5 + $0x2b0] sm:$0xff]  ;;  %v3759_v37 = vld [vmem:[#allocation5 + $0x258] sm:$0xff]  ;;  %v3793_v7 = vld [vmem:[#allocation5 + $0x368] sm:$0xff] }
  0x27   :  { %2270 = vmatpush.bf16.msra.mxu3 %v3709_v27  ;;  %v3778_v27 = vld [vmem:[#allocation5 + $0x2f0] sm:$0xff]  ;;  %v3784_v10 = vld [vmem:[#allocation5 + $0x320] sm:$0xff]  ;;  %v3783_v14 = vld [vmem:[#allocation5 + $0x318] sm:$0xff] }
  0x28   :  { %2232 = vmatpush.bf16.msra.mxu0 %v3684_v30  ;;  %v3769_v30 = vld [vmem:[#allocation5 + $0x2a8] sm:$0xff]  ;;  %v3792_v11 = vld [vmem:[#allocation5 + $0x360] sm:$0xff]  ;;  %v3791_v15 = vld [vmem:[#allocation5 + $0x358] sm:$0xff] }
  0x29   :  { %2245 = vmatpush.bf16.msra.mxu1 %v3692_v31  ;;  %v3777_v31 = vld [vmem:[#allocation5 + $0x2e8] sm:$0xff] }
  0x2a   :  { %2258 = vmatpush.bf16.msra.mxu2 %v3700_v34  ;;  %v3768_v34 = vld [vmem:[#allocation5 + $0x2a0] sm:$0xff] }
  0x2b   :  { %2271 = vmatpush.bf16.msra.mxu3 %v3708_v35  ;;  %2233 = vmatmul.bf16.vlgmr.msra.gmra.mxu0 %v625_v43  ;;  %v3776_v35 = vld [vmem:[#allocation5 + $0x2e0] sm:$0xff]  ;;  %v3774_v43 = vld [vmem:[#allocation5 + $0x2d0] sm:$0xff] }
  0x2c   :  { %2277 = vmatpush.bf16.msrb.mxu0 %v3723_v38  ;;  %2246 = vmatmul.bf16.vlgmr.msra.gmra.mxu1 %v626_v45  ;;  %v3767_v38 = vld [vmem:[#allocation5 + $0x298] sm:$0xff]  ;;  %v3757_v45 = vld [vmem:[#allocation5 + $0x248] sm:$0xff] }
  0x2d   :  { %2290 = vmatpush.bf16.msrb.mxu1 %v3731_v39  ;;  %2259 = vmatmul.bf16.vlgmr.msra.gmra.mxu2 %v627_v42  ;;  %v3775_v39 = vld [vmem:[#allocation5 + $0x2d8] sm:$0xff]  ;;  %v3766_v42 = vld [vmem:[#allocation5 + $0x290] sm:$0xff] }
  0x2e   :  { %2303 = vmatpush.bf16.msrb.mxu2 %v3739_v40  ;;  %2272 = vmatmul.bf16.vlgmr.msra.gmra.mxu3 %v628_v44  ;;  %v3750_v40 = vld [vmem:[#allocation5 + $0x210] sm:$0xff]  ;;  %v3749_v44 = vld [vmem:[#allocation5 + $0x208] sm:$0xff] }
  0x2f   :  { %2316 = vmatpush.bf16.msrb.mxu3 %v3747_v41  ;;  %v3758_v41 = vld [vmem:[#allocation5 + $0x250] sm:$0xff] }
  0x30   :  { %2278 = vmatpush.bf16.msrb.mxu0 %v3722_v46  ;;  %v3765_v46 = vld [vmem:[#allocation5 + $0x288] sm:$0xff] }
  0x31   :  { %2291 = vmatpush.bf16.msrb.mxu1 %v3730_v47  ;;  %v3773_v47 = vld [vmem:[#allocation5 + $0x2c8] sm:$0xff] }
  0x32   :  { %2304 = vmatpush.bf16.msrb.mxu2 %v3738_v48  ;;  %v49_v48 = vld [vmem:[#allocation2 + $0x20] sm:$0xff] }
  0x33   :  { %2317 = vmatpush.bf16.msrb.mxu3 %v3746_v49  ;;  %v50_v49 = vld [vmem:[#allocation2 + $0x28] sm:$0xff] }
  0x34   :  { %2279 = vmatpush.bf16.msrb.mxu0 %v3721_v50  ;;  %v3748_v50 = vld [vmem:[#allocation5 + $0x200] sm:$0xff] }
  0x35   :  { %2292 = vmatpush.bf16.msrb.mxu1 %v3729_v51  ;;  %v3756_v51 = vld [vmem:[#allocation5 + $0x240] sm:$0xff] }
  0x36   :  { %2305 = vmatpush.bf16.msrb.mxu2 %v3737_v52  ;;  %v601_v52 = vunpack.c.l.b16 %v49_v48 }
  0x37   :  { %2318 = vmatpush.bf16.msrb.mxu3 %v3745_v53  ;;  %v603_v53 = vunpack.c.l.b16 %v50_v49 }
  0x38   :  { %2280 = vmatpush.bf16.msrb.mxu0 %v3720_v54  ;;  %v3764_v54 = vld [vmem:[#allocation5 + $0x280] sm:$0xff] }
  0x39   :  { %2293 = vmatpush.bf16.msrb.mxu1 %v3728_v55  ;;  %v3772_v55 = vld [vmem:[#allocation5 + $0x2c0] sm:$0xff] }
  0x3a   :  { %2306 = vmatpush.bf16.msrb.mxu2 %v3736_v56  ;;  %v602_v56 = vunpack.c.h.b16 %v49_v48  ;;  %v3817_v48 = vld [vmem:[#allocation5 + $0x428] sm:$0xff] }
  0x3b   :  { %2319 = vmatpush.bf16.msrb.mxu3 %v3744_v57  ;;  %v604_v57 = vunpack.c.h.b16 %v50_v49  ;;  %v3825_v49 = vld [vmem:[#allocation5 + $0x468] sm:$0xff] }
  0x3c   :  { %2281 = vmatpush.bf16.msrb.mxu0 %v3719_v58  ;;  %v3787_v58 = vld [vmem:[#allocation5 + $0x338] sm:$0xff] }
  0x3d   :  { %2294 = vmatpush.bf16.msrb.mxu1 %v3727_v59  ;;  %v3795_v59 = vld [vmem:[#allocation5 + $0x378] sm:$0xff] }
  0x3e   :  { %2307 = vmatpush.bf16.msrb.mxu2 %v3735_v60  ;;  %v3803_v60 = vld [vmem:[#allocation5 + $0x3b8] sm:$0xff] }
  0x3f   :  { %2320 = vmatpush.bf16.msrb.mxu3 %v3743_v61  ;;  %v3811_v61 = vld [vmem:[#allocation5 + $0x3f8] sm:$0xff] }
  0x40   :  { %2282 = vmatpush.bf16.msrb.mxu0 %v3718_v62  ;;  %v633_v62 = vpack.c.b16 %v601_v52, %v601_v52  ;;  %v3816_v52 = vld [vmem:[#allocation5 + $0x420] sm:$0xff] }
  0x41   :  { %2295 = vmatpush.bf16.msrb.mxu1 %v3726_v63  ;;  %v635_v63 = vpack.c.b16 %v603_v53, %v603_v53  ;;  %v3824_v53 = vld [vmem:[#allocation5 + $0x460] sm:$0xff] }
  0x42   :  { %2308 = vmatpush.bf16.msrb.mxu2 %v3734_v0  ;;  %v634_v0 = vpack.c.b16 %v602_v56, %v602_v56  ;;  %v3815_v56 = vld [vmem:[#allocation5 + $0x418] sm:$0xff] }
  0x43   :  { %2321 = vmatpush.bf16.msrb.mxu3 %v3742_v1  ;;  %v636_v1 = vpack.c.b16 %v604_v57, %v604_v57  ;;  %v3823_v57 = vld [vmem:[#allocation5 + $0x458] sm:$0xff] }
  0x44   :  { %2283 = vmatpush.bf16.msrb.mxu0 %v3717_v2  ;;  %v3786_v2 = vld [vmem:[#allocation5 + $0x330] sm:$0xff] }
  0x45   :  { %2296 = vmatpush.bf16.msrb.mxu1 %v3725_v3  ;;  %v3794_v3 = vld [vmem:[#allocation5 + $0x370] sm:$0xff] }
  0x46   :  { %2309 = vmatpush.bf16.msrb.mxu2 %v3733_v4  ;;  %v3802_v4 = vld [vmem:[#allocation5 + $0x3b0] sm:$0xff] }
  0x47   :  { %2322 = vmatpush.bf16.msrb.mxu3 %v3741_v5  ;;  %v3810_v5 = vld [vmem:[#allocation5 + $0x3f0] sm:$0xff] }
  0x48   :  { %2284 = vmatpush.bf16.msrb.mxu0 %v3716_v8  ;;  %v3801_v8 = vld [vmem:[#allocation5 + $0x3a8] sm:$0xff] }
  0x49   :  { %2297 = vmatpush.bf16.msrb.mxu1 %v3724_v9  ;;  %v3809_v9 = vld [vmem:[#allocation5 + $0x3e8] sm:$0xff] }
  0x4a   :  { %2310 = vmatpush.bf16.msrb.mxu2 %v3732_v12  ;;  %v3800_v12 = vld [vmem:[#allocation5 + $0x3a0] sm:$0xff] }
  0x4b   :  { %2323 = vmatpush.bf16.msrb.mxu3 %v3740_v13  ;;  %2285 = vmatmul.bf16.vlgmr.msrb.gmra.mxu0 %v629_v21  ;;  %v3808_v13 = vld [vmem:[#allocation5 + $0x3e0] sm:$0xff]  ;;  %v3806_v21 = vld [vmem:[#allocation5 + $0x3d0] sm:$0xff] }
  0x4c   :  { %2329 = vmatpush.bf16.msra.mxu0 %v3755_v16  ;;  %2298 = vmatmul.bf16.vlgmr.msrb.gmra.mxu1 %v630_v23  ;;  %v3799_v16 = vld [vmem:[#allocation5 + $0x398] sm:$0xff]  ;;  %v3789_v23 = vld [vmem:[#allocation5 + $0x348] sm:$0xff] }
  0x4d   :  { %2342 = vmatpush.bf16.msra.mxu1 %v3763_v17  ;;  %2311 = vmatmul.bf16.vlgmr.msrb.gmra.mxu2 %v631_v20  ;;  %v3807_v17 = vld [vmem:[#allocation5 + $0x3d8] sm:$0xff]  ;;  %v3798_v20 = vld [vmem:[#allocation5 + $0x390] sm:$0xff] }
  0x4e   :  { %2355 = vmatpush.bf16.msra.mxu2 %v3771_v18  ;;  %2324 = vmatmul.bf16.vlgmr.msrb.gmra.mxu3 %v632_v22  ;;  %v3782_v18 = vld [vmem:[#allocation5 + $0x310] sm:$0xff]  ;;  %v3781_v22 = vld [vmem:[#allocation5 + $0x308] sm:$0xff] }
  0x4f   :  { %2368 = vmatpush.bf16.msra.mxu3 %v3779_v19  ;;  %v3790_v19 = vld [vmem:[#allocation5 + $0x350] sm:$0xff] }
  0x50   :  { %2330 = vmatpush.bf16.msra.mxu0 %v3754_v24  ;;  %v3797_v24 = vld [vmem:[#allocation5 + $0x388] sm:$0xff] }
  0x51   :  { %2343 = vmatpush.bf16.msra.mxu1 %v3762_v25  ;;  %v3805_v25 = vld [vmem:[#allocation5 + $0x3c8] sm:$0xff] }
  0x52   :  { %2356 = vmatpush.bf16.msra.mxu2 %v3770_v26  ;;  %v51_v26 = vld [vmem:[#allocation2 + $0x30] sm:$0xff] }
  0x53   :  { %2369 = vmatpush.bf16.msra.mxu3 %v3778_v27  ;;  %v52_v27 = vld [vmem:[#allocation2 + $0x38] sm:$0xff] }
  0x54   :  { %2331 = vmatpush.bf16.msra.mxu0 %v3753_v28  ;;  %v3780_v28 = vld [vmem:[#allocation5 + $0x300] sm:$0xff] }
  0x55   :  { %2344 = vmatpush.bf16.msra.mxu1 %v3761_v29  ;;  %v3788_v29 = vld [vmem:[#allocation5 + $0x340] sm:$0xff] }
  0x56   :  { %2357 = vmatpush.bf16.msra.mxu2 %v3769_v30  ;;  %v605_v30 = vunpack.c.l.b16 %v51_v26 }
  0x57   :  { %2370 = vmatpush.bf16.msra.mxu3 %v3777_v31  ;;  %v607_v31 = vunpack.c.l.b16 %v52_v27 }
  0x58   :  { %2332 = vmatpush.bf16.msra.mxu0 %v3752_v32  ;;  %v3796_v32 = vld [vmem:[#allocation5 + $0x380] sm:$0xff] }
  0x59   :  { %2345 = vmatpush.bf16.msra.mxu1 %v3760_v33  ;;  %v3804_v33 = vld [vmem:[#allocation5 + $0x3c0] sm:$0xff] }
  0x5a   :  { %2358 = vmatpush.bf16.msra.mxu2 %v3768_v34  ;;  %v606_v34 = vunpack.c.h.b16 %v51_v26  ;;  %v3849_v26 = vld [vmem:[#allocation5 + $0x528] sm:$0xff] }
  0x5b   :  { %2371 = vmatpush.bf16.msra.mxu3 %v3776_v35  ;;  %v608_v35 = vunpack.c.h.b16 %v52_v27  ;;  %v3857_v27 = vld [vmem:[#allocation5 + $0x568] sm:$0xff] }
  0x5c   :  { %2333 = vmatpush.bf16.msra.mxu0 %v3751_v36  ;;  %v3819_v36 = vld [vmem:[#allocation5 + $0x438] sm:$0xff] }
  0x5d   :  { %2346 = vmatpush.bf16.msra.mxu1 %v3759_v37  ;;  %v3827_v37 = vld [vmem:[#allocation5 + $0x478] sm:$0xff] }
  0x5e   :  { %2359 = vmatpush.bf16.msra.mxu2 %v3767_v38  ;;  %v3835_v38 = vld [vmem:[#allocation5 + $0x4b8] sm:$0xff] }
  0x5f   :  { %2372 = vmatpush.bf16.msra.mxu3 %v3775_v39  ;;  %v3843_v39 = vld [vmem:[#allocation5 + $0x4f8] sm:$0xff] }
  0x60   :  { %2334 = vmatpush.bf16.msra.mxu0 %v3750_v40  ;;  %v637_v40 = vpack.c.b16 %v605_v30, %v605_v30  ;;  %v3873_v30 = vld [vmem:[#allocation5 + $0x5e8] sm:$0xff] }
  0x61   :  { %2347 = vmatpush.bf16.msra.mxu1 %v3758_v41  ;;  %v639_v41 = vpack.c.b16 %v607_v31, %v607_v31 }
  0x62   :  { %2360 = vmatpush.bf16.msra.mxu2 %v3766_v42  ;;  %v638_v42 = vpack.c.b16 %v606_v34, %v606_v34 }
  0x63   :  { %2373 = vmatpush.bf16.msra.mxu3 %v3774_v43  ;;  %v640_v43 = vpack.c.b16 %v608_v35, %v608_v35 }
  0x64   :  { %2335 = vmatpush.bf16.msra.mxu0 %v3749_v44  ;;  %v3818_v44 = vld [vmem:[#allocation5 + $0x430] sm:$0xff] }
  0x65   :  { %2348 = vmatpush.bf16.msra.mxu1 %v3757_v45  ;;  %v3826_v45 = vld [vmem:[#allocation5 + $0x470] sm:$0xff] }
  0x66   :  { %2361 = vmatpush.bf16.msra.mxu2 %v3765_v46  ;;  %v3834_v46 = vld [vmem:[#allocation5 + $0x4b0] sm:$0xff] }
  0x67   :  { %2374 = vmatpush.bf16.msra.mxu3 %v3773_v47  ;;  %v3842_v47 = vld [vmem:[#allocation5 + $0x4f0] sm:$0xff] }
  0x68   :  { %2336 = vmatpush.bf16.msra.mxu0 %v3748_v50  ;;  %v3833_v50 = vld [vmem:[#allocation5 + $0x4a8] sm:$0xff] }
  0x69   :  { %2349 = vmatpush.bf16.msra.mxu1 %v3756_v51  ;;  %v3841_v51 = vld [vmem:[#allocation5 + $0x4e8] sm:$0xff] }
  0x6a   :  { %2362 = vmatpush.bf16.msra.mxu2 %v3764_v54  ;;  %v3832_v54 = vld [vmem:[#allocation5 + $0x4a0] sm:$0xff] }
  0x6b   :  { %2375 = vmatpush.bf16.msra.mxu3 %v3772_v55  ;;  %2337 = vmatmul.bf16.vlgmr.msra.gmra.mxu0 %v633_v62  ;;  %v3840_v55 = vld [vmem:[#allocation5 + $0x4e0] sm:$0xff]  ;;  %v3830_v62 = vld [vmem:[#allocation5 + $0x490] sm:$0xff] }
  0x6c   :  { %2381 = vmatpush.bf16.msrb.mxu0 %v3787_v58  ;;  %2350 = vmatmul.bf16.vlgmr.msra.gmra.mxu1 %v634_v0  ;;  %v3831_v58 = vld [vmem:[#allocation5 + $0x498] sm:$0xff]  ;;  %v3813_v0 = vld [vmem:[#allocation5 + $0x408] sm:$0xff] }
  0x6d   :  { %2394 = vmatpush.bf16.msrb.mxu1 %v3795_v59  ;;  %2363 = vmatmul.bf16.vlgmr.msra.gmra.mxu2 %v635_v63  ;;  %v3839_v59 = vld [vmem:[#allocation5 + $0x4d8] sm:$0xff]  ;;  %v3838_v63 = vld [vmem:[#allocation5 + $0x4d0] sm:$0xff] }
  0x6e   :  { %2407 = vmatpush.bf16.msrb.mxu2 %v3803_v60  ;;  %2376 = vmatmul.bf16.vlgmr.msra.gmra.mxu3 %v636_v1  ;;  %v3814_v60 = vld [vmem:[#allocation5 + $0x410] sm:$0xff]  ;;  %v3821_v1 = vld [vmem:[#allocation5 + $0x448] sm:$0xff] }
  0x6f   :  { %2420 = vmatpush.bf16.msrb.mxu3 %v3811_v61  ;;  %v3822_v61 = vld [vmem:[#allocation5 + $0x450] sm:$0xff] }
  0x70   :  { %2382 = vmatpush.bf16.msrb.mxu0 %v3786_v2  ;;  %v3829_v2 = vld [vmem:[#allocation5 + $0x488] sm:$0xff] }
  0x71   :  { %2395 = vmatpush.bf16.msrb.mxu1 %v3794_v3  ;;  %v3837_v3 = vld [vmem:[#allocation5 + $0x4c8] sm:$0xff] }
  0x72   :  { %2408 = vmatpush.bf16.msrb.mxu2 %v3802_v4  ;;  %v53_v4 = vld [vmem:[#allocation2 + $0x40] sm:$0xff] }
  0x73   :  { %2421 = vmatpush.bf16.msrb.mxu3 %v3810_v5  ;;  %v54_v5 = vld [vmem:[#allocation2 + $0x48] sm:$0xff] }
  0x74   :  { %2383 = vmatpush.bf16.msrb.mxu0 %v3785_v6  ;;  %v3812_v6 = vld [vmem:[#allocation5 + $0x400] sm:$0xff] }
  0x75   :  { %2396 = vmatpush.bf16.msrb.mxu1 %v3793_v7  ;;  %v3820_v7 = vld [vmem:[#allocation5 + $0x440] sm:$0xff] }
  0x76   :  { %2409 = vmatpush.bf16.msrb.mxu2 %v3801_v8  ;;  %v609_v8 = vunpack.c.l.b16 %v53_v4 }
  0x77   :  { %2422 = vmatpush.bf16.msrb.mxu3 %v3809_v9  ;;  %v611_v9 = vunpack.c.l.b16 %v54_v5 }
  0x78   :  { %2384 = vmatpush.bf16.msrb.mxu0 %v3784_v10  ;;  %v3828_v10 = vld [vmem:[#allocation5 + $0x480] sm:$0xff] }
  0x79   :  { %2397 = vmatpush.bf16.msrb.mxu1 %v3792_v11  ;;  %v3836_v11 = vld [vmem:[#allocation5 + $0x4c0] sm:$0xff] }
  0x7a   :  { %2410 = vmatpush.bf16.msrb.mxu2 %v3800_v12  ;;  %v610_v12 = vunpack.c.h.b16 %v53_v4 }
  0x7b   :  { %2423 = vmatpush.bf16.msrb.mxu3 %v3808_v13  ;;  %v612_v13 = vunpack.c.h.b16 %v54_v5  ;;  %v3883_v5 = vld [vmem:[#allocation5 + $0x638] sm:$0xff] }
  0x7c   :  { %2385 = vmatpush.bf16.msrb.mxu0 %v3783_v14  ;;  %v3851_v14 = vld [vmem:[#allocation5 + $0x538] sm:$0xff] }
  0x7d   :  { %2398 = vmatpush.bf16.msrb.mxu1 %v3791_v15  ;;  %v3859_v15 = vld [vmem:[#allocation5 + $0x578] sm:$0xff] }
  0x7e   :  { %2411 = vmatpush.bf16.msrb.mxu2 %v3799_v16  ;;  %v3867_v16 = vld [vmem:[#allocation5 + $0x5b8] sm:$0xff] }
  0x7f   :  { %2424 = vmatpush.bf16.msrb.mxu3 %v3807_v17  ;;  %v3875_v17 = vld [vmem:[#allocation5 + $0x5f8] sm:$0xff] }
  0x80   :  { %2386 = vmatpush.bf16.msrb.mxu0 %v3782_v18  ;;  %v641_v18 = vpack.c.b16 %v609_v8, %v609_v8  ;;  %v3907_v8 = vld [vmem:[#allocation5 + $0x6f8] sm:$0xff] }
  0x81   :  { %2399 = vmatpush.bf16.msrb.mxu1 %v3790_v19  ;;  %v643_v19 = vpack.c.b16 %v611_v9, %v611_v9 }
  0x82   :  { %2412 = vmatpush.bf16.msrb.mxu2 %v3798_v20  ;;  %v642_v20 = vpack.c.b16 %v610_v12, %v610_v12 }
  0x83   :  { %2425 = vmatpush.bf16.msrb.mxu3 %v3806_v21  ;;  %v644_v21 = vpack.c.b16 %v612_v13, %v612_v13  ;;  %v3882_v13 = vld [vmem:[#allocation5 + $0x630] sm:$0xff] }
  0x84   :  { %2387 = vmatpush.bf16.msrb.mxu0 %v3781_v22  ;;  %v3850_v22 = vld [vmem:[#allocation5 + $0x530] sm:$0xff] }
  0x85   :  { %2400 = vmatpush.bf16.msrb.mxu1 %v3789_v23  ;;  %v3858_v23 = vld [vmem:[#allocation5 + $0x570] sm:$0xff] }
  0x86   :  { %2413 = vmatpush.bf16.msrb.mxu2 %v3797_v24  ;;  %v3866_v24 = vld [vmem:[#allocation5 + $0x5b0] sm:$0xff] }
  0x87   :  { %2426 = vmatpush.bf16.msrb.mxu3 %v3805_v25  ;;  %v3874_v25 = vld [vmem:[#allocation5 + $0x5f0] sm:$0xff] }
  0x88   :  { %2388 = vmatpush.bf16.msrb.mxu0 %v3780_v28  ;;  %v3945_v28 = vld [vmem:[%s4069_s2] ss:$0 sm:$0xff]  ;;  %s4028_s2 = smov [#allocation7]  }
  0x89   :  { %2401 = vmatpush.bf16.msrb.mxu1 %v3788_v29  ;;  %v3865_v29 = vld [vmem:[#allocation5 + $0x5a8] sm:$0xff]  ;;  %s2647_s24 = sshll.u32 %s4028_s2, 4  ;;  %s2648_s24 = int_to_ptr.vmem [resolvable:$true] %s2647_s24 }
  0x8a   :  { %2414 = vmatpush.bf16.msrb.mxu2 %v3796_v32  ;;  %v3848_v32 = vld [vmem:[#allocation5 + $0x520] sm:$0xff] }
  0x8b   :  { %2427 = vmatpush.bf16.msrb.mxu3 %v3804_v33  ;;  %2389 = vmatmul.bf16.vlgmr.msrb.gmra.mxu0 %v637_v40  ;;  %v3856_v33 = vld [vmem:[#allocation5 + $0x560] sm:$0xff]  ;;  %v3855_v40 = vld [vmem:[#allocation5 + $0x558] sm:$0xff] }
  0x8c   :  { %2433 = vmatpush.bf16.msra.mxu0 %v3819_v36  ;;  %2402 = vmatmul.bf16.vlgmr.msrb.gmra.mxu1 %v638_v42  ;;  %v3864_v36 = vld [vmem:[#allocation5 + $0x5a0] sm:$0xff]  ;;  %v3871_v42 = vld [vmem:[#allocation5 + $0x5d8] sm:$0xff] }
  0x8d   :  { %2446 = vmatpush.bf16.msra.mxu1 %v3827_v37  ;;  %2415 = vmatmul.bf16.vlgmr.msrb.gmra.mxu2 %v639_v41  ;;  %v3872_v37 = vld [vmem:[#allocation5 + $0x5e0] sm:$0xff]  ;;  %v3863_v41 = vld [vmem:[#allocation5 + $0x598] sm:$0xff] }
  0x8e   :  { %2459 = vmatpush.bf16.msra.mxu2 %v3835_v38  ;;  %2428 = vmatmul.bf16.vlgmr.msrb.gmra.mxu3 %v640_v43 }
  0x8f   :  { %2472 = vmatpush.bf16.msra.mxu3 %v3843_v39  ;;  %v3847_v39 = vld [vmem:[#allocation5 + $0x518] sm:$0xff] }
  0x90   :  { %2434 = vmatpush.bf16.msra.mxu0 %v3818_v44 }
  0x91   :  { %2447 = vmatpush.bf16.msra.mxu1 %v3826_v45 }
  0x92   :  { %2460 = vmatpush.bf16.msra.mxu2 %v3834_v46 }
  0x93   :  { %2473 = vmatpush.bf16.msra.mxu3 %v3842_v47  ;;  %v3846_v47 = vld [vmem:[#allocation5 + $0x510] sm:$0xff] }
  0x94   :  { %2435 = vmatpush.bf16.msra.mxu0 %v3817_v48  ;;  %v3854_v48 = vld [vmem:[#allocation5 + $0x550] sm:$0xff] }
  0x95   :  { %2448 = vmatpush.bf16.msra.mxu1 %v3825_v49 }
  0x96   :  { %2461 = vmatpush.bf16.msra.mxu2 %v3833_v50 }
  0x97   :  { %2474 = vmatpush.bf16.msra.mxu3 %v3841_v51  ;;  %v3862_v51 = vld [vmem:[#allocation5 + $0x590] sm:$0xff] }
  0x98   :  { %2436 = vmatpush.bf16.msra.mxu0 %v3816_v52  ;;  %v3870_v52 = vld [vmem:[#allocation5 + $0x5d0] sm:$0xff] }
  0x99   :  { %2449 = vmatpush.bf16.msra.mxu1 %v3824_v53  ;;  %v3845_v53 = vld [vmem:[#allocation5 + $0x508] sm:$0xff] }
  0x9a   :  { %2462 = vmatpush.bf16.msra.mxu2 %v3832_v54  ;;  %v3853_v54 = vld [vmem:[#allocation5 + $0x548] sm:$0xff] }
  0x9b   :  { %2475 = vmatpush.bf16.msra.mxu3 %v3840_v55  ;;  %v3861_v55 = vld [vmem:[#allocation5 + $0x588] sm:$0xff] }
  0x9c   :  { %2437 = vmatpush.bf16.msra.mxu0 %v3815_v56  ;;  %v3869_v56 = vld [vmem:[#allocation5 + $0x5c8] sm:$0xff] }
  0x9d   :  { %2450 = vmatpush.bf16.msra.mxu1 %v3823_v57  ;;  %v55_v57 = vld [vmem:[#allocation2 + $0x50] sm:$0xff] }
  0x9e   :  { %2463 = vmatpush.bf16.msra.mxu2 %v3831_v58  ;;  %v56_v58 = vld [vmem:[#allocation2 + $0x58] sm:$0xff] }
  0x9f   :  { %2476 = vmatpush.bf16.msra.mxu3 %v3839_v59  ;;  %v616_v4 = vunpack.c.h.b16 %v56_v58 }
  0xa0   :  { %2438 = vmatpush.bf16.msra.mxu0 %v3814_v60 }
  0xa1   :  { %2451 = vmatpush.bf16.msra.mxu1 %v3822_v61  ;;  %v3844_v61 = vld [vmem:[#allocation5 + $0x500] sm:$0xff]  ;;  %v648_v12 = vpack.c.b16 %v616_v4, %v616_v4  ;;  %v3922_v4 = vld [vmem:[#allocation5 + $0x770] sm:$0xff] }
  0xa2   :  { %2464 = vmatpush.bf16.msra.mxu2 %v3830_v62  ;;  %v3852_v62 = vld [vmem:[#allocation5 + $0x540] sm:$0xff] }
  0xa3   :  { %2477 = vmatpush.bf16.msra.mxu3 %v3838_v63  ;;  %v613_v63 = vunpack.c.l.b16 %v55_v57 }
  0xa4   :  { %2439 = vmatpush.bf16.msra.mxu0 %v3813_v0  ;;  %v615_v0 = vunpack.c.l.b16 %v56_v58 }
  0xa5   :  { %2452 = vmatpush.bf16.msra.mxu1 %v3821_v1  ;;  %v3860_v1 = vld [vmem:[#allocation5 + $0x580] sm:$0xff]  ;;  %v645_v9 = vpack.c.b16 %v613_v63, %v613_v63 }
  0xa6   :  { %2465 = vmatpush.bf16.msra.mxu2 %v3829_v2  ;;  %v3868_v2 = vld [vmem:[#allocation5 + $0x5c0] sm:$0xff] }
  0xa7   :  { %2478 = vmatpush.bf16.msra.mxu3 %v3837_v3  ;;  %v614_v3 = vunpack.c.h.b16 %v55_v57 }
  0xa8   :  { %2440 = vmatpush.bf16.msra.mxu0 %v3812_v6  ;;  %v2234_v31 = vpop.f32.mrf.mxu0  ;;  %v3891_v6 = vld [vmem:[#allocation5 + $0x678] sm:$0xff] }
  0xa9   :  { %2453 = vmatpush.bf16.msra.mxu1 %v3820_v7  ;;  %v2235_v34 = vadd.f32 %v3945_v28, %v2234_v31  ;;  %v2247_v35 = vpop.f32.mrf.mxu1  ;;  %v3899_v7 = vld [vmem:[#allocation5 + $0x6b8] sm:$0xff] }
  0xaa   :  { %2466 = vmatpush.bf16.msra.mxu2 %v3828_v10  ;;  %v647_v10 = vpack.c.b16 %v615_v0, %v615_v0  ;;  %v3895_v31 = vld [vmem:[#allocation5 + $0x698] sm:$0xff] }
  0xab   :  { %2479 = vmatpush.bf16.msra.mxu3 %v3836_v11  ;;  %2441 = vmatmul.bf16.vlgmr.msra.gmra.mxu0 %v641_v18  ;;  %v2248_v38 = vadd.f32 %v2247_v35, %v2235_v34  ;;  %v646_v11 = vpack.c.b16 %v614_v3, %v614_v3  ;;  %v3889_v18 = vld [vmem:[#allocation5 + $0x668] sm:$0xff]  ;;  %v3914_v3 = vld [vmem:[#allocation5 + $0x730] sm:$0xff] }
  0xac   :  { %2485 = vmatpush.bf16.msrb.mxu0 %v3851_v14  ;;  %2454 = vmatmul.bf16.vlgmr.msra.gmra.mxu1 %v642_v20  ;;  %v3890_v14 = vld [vmem:[#allocation5 + $0x670] sm:$0xff]  ;;  %v3905_v20 = vld [vmem:[#allocation5 + $0x6e8] sm:$0xff] }
  0xad   :  { %2498 = vmatpush.bf16.msrb.mxu1 %v3859_v15  ;;  %2467 = vmatmul.bf16.vlgmr.msra.gmra.mxu2 %v643_v19  ;;  %v3898_v15 = vld [vmem:[#allocation5 + $0x6b0] sm:$0xff]  ;;  %v3897_v19 = vld [vmem:[#allocation5 + $0x6a8] sm:$0xff] }
  0xae   :  { %2511 = vmatpush.bf16.msrb.mxu2 %v3867_v16  ;;  %2480 = vmatmul.bf16.vlgmr.msra.gmra.mxu3 %v644_v21  ;;  %v3906_v16 = vld [vmem:[#allocation5 + $0x6f0] sm:$0xff] }
  0xaf   :  { %2524 = vmatpush.bf16.msrb.mxu3 %v3875_v17  ;;  %v3881_v17 = vld [vmem:[#allocation5 + $0x628] sm:$0xff] }
  0xb0   :  { %2486 = vmatpush.bf16.msrb.mxu0 %v3850_v22  ;;  %v2260_v43 = vpop.f32.mrf.mxu2  ;;  %v2236_v46 = vpop.f32.mrf.mxu0  ;;  %v3880_v22 = vld [vmem:[#allocation5 + $0x620] sm:$0xff] }
  0xb1   :  { %2499 = vmatpush.bf16.msrb.mxu1 %v3858_v23  ;;  %v2261_v44 = vadd.f32 %v2260_v43, %v2248_v38  ;;  %v2273_v45 = vpop.f32.mrf.mxu3  ;;  %v2249_v50 = vpop.f32.mrf.mxu1  ;;  %v3888_v23 = vld [vmem:[#allocation5 + $0x660] sm:$0xff]  ;;  %v3886_v38 = vld [vmem:[#allocation5 + $0x650] sm:$0xff]  ;;  %v3877_v43 = vld [vmem:[#allocation5 + $0x608] sm:$0xff] }
  0xb2   :  { %2512 = vmatpush.bf16.msrb.mxu2 %v3866_v24  ;;  %v3901_v46 = vld [vmem:[#allocation5 + $0x6c8] sm:$0xff] }
  0xb3   :  { %2525 = vmatpush.bf16.msrb.mxu3 %v3874_v25  ;;  %v4058_v49 = vadd.f32 %v2273_v45, %v2261_v44  ;;  %v3885_v44 = vld [vmem:[#allocation5 + $0x648] sm:$0xff] }
  0xb4   :  { %2487 = vmatpush.bf16.msrb.mxu0 %v3849_v26  ;;  %v3896_v26 = vld [vmem:[#allocation5 + $0x6a0] sm:$0xff]  ;;  %v3893_v45 = vld [vmem:[#allocation5 + $0x688] sm:$0xff] }
  0xb5   :  { %2500 = vmatpush.bf16.msrb.mxu1 %v3857_v27  ;;  %v3904_v27 = vld [vmem:[#allocation5 + $0x6e0] sm:$0xff] }
  0xb6   :  { %2513 = vmatpush.bf16.msrb.mxu2 %v3865_v29  ;;  %v3879_v29 = vld [vmem:[#allocation5 + $0x618] sm:$0xff] }
  0xb7   :  { %2526 = vmatpush.bf16.msrb.mxu3 %v3873_v30  ;;  %v3887_v30 = vld [vmem:[#allocation5 + $0x658] sm:$0xff] }
  0xb8   :  { %2488 = vmatpush.bf16.msrb.mxu0 %v3848_v32  ;;  %v2262_v59 = vpop.f32.mrf.mxu2  ;;  %v3903_v32 = vld [vmem:[#allocation5 + $0x6d8] sm:$0xff] }
  0xb9   :  { %2501 = vmatpush.bf16.msrb.mxu1 %v3856_v33  ;;  %v2275_v60 = vpop.f32.mrf.mxu3  ;;  %v3915_v59 = vld [vmem:[#allocation5 + $0x738] sm:$0xff] }
  0xba   :  { %2514 = vmatpush.bf16.msrb.mxu2 %v3864_v36  ;;  %v3923_v60 = vld [vmem:[#allocation5 + $0x778] sm:$0xff] }
  0xbb   :  { %2527 = vmatpush.bf16.msrb.mxu3 %v3872_v37  ;;  %v3878_v37 = vld [vmem:[#allocation5 + $0x610] sm:$0xff] }
  0xbc   :  { %2489 = vmatpush.bf16.msrb.mxu0 %v3847_v39 }
  0xbd   :  { %2502 = vmatpush.bf16.msrb.mxu1 %v3855_v40 }
  0xbe   :  { %2515 = vmatpush.bf16.msrb.mxu2 %v3863_v41  ;;  %v3894_v41 = vld [vmem:[#allocation5 + $0x690] sm:$0xff] }
  0xbf   :  { %2528 = vmatpush.bf16.msrb.mxu3 %v3871_v42  ;;  %v3902_v42 = vld [vmem:[#allocation5 + $0x6d0] sm:$0xff] }
  0xc0   :  { %2490 = vmatpush.bf16.msrb.mxu0 %v3846_v47  ;;  %v57_v47 = vld [vmem:[#allocation2 + $0x60] sm:$0xff] }
  0xc1   :  { %2503 = vmatpush.bf16.msrb.mxu1 %v3854_v48  ;;  %v58_v48 = vld [vmem:[#allocation2 + $0x68] sm:$0xff]  ;;  %v618_v57 = vunpack.c.h.b16 %v57_v47 }
  0xc2   :  { %2516 = vmatpush.bf16.msrb.mxu2 %v3862_v51  ;;  %v3876_v51 = vld [vmem:[#allocation5 + $0x600] sm:$0xff]  ;;  %v620_v58 = vunpack.c.h.b16 %v58_v48 }
  0xc3   :  { %2529 = vmatpush.bf16.msrb.mxu3 %v3870_v52  ;;  %v3884_v52 = vld [vmem:[#allocation5 + $0x640] sm:$0xff] }
  0xc4   :  { %2491 = vmatpush.bf16.msrb.mxu0 %v3845_v53  ;;  %v617_v53 = vunpack.c.l.b16 %v57_v47  ;;  %v3924_v47 = vld [vmem:[#allocation5 + $0x780] sm:$0xff] }
  0xc5   :  { %2504 = vmatpush.bf16.msrb.mxu1 %v3853_v54  ;;  %v619_v54 = vunpack.c.l.b16 %v58_v48  ;;  %v3932_v48 = vld [vmem:[#allocation5 + $0x7c0] sm:$0xff] }
  0xc6   :  { %2517 = vmatpush.bf16.msrb.mxu2 %v3861_v55  ;;  %v3892_v55 = vld [vmem:[#allocation5 + $0x680] sm:$0xff]  ;;  %v649_v63 = vpack.c.b16 %v617_v53, %v617_v53 }
  0xc7   :  { %2530 = vmatpush.bf16.msrb.mxu3 %v3869_v56  ;;  %v3900_v56 = vld [vmem:[#allocation5 + $0x6c0] sm:$0xff]  ;;  %v651_v0 = vpack.c.b16 %v619_v54, %v619_v54 }
  0xc8   :  { %2492 = vmatpush.bf16.msrb.mxu0 %v3844_v61  ;;  %v2286_v21 = vpop.f32.mrf.mxu0  ;;  %v3931_v61 = vld [vmem:[#allocation5 + $0x7b8] sm:$0xff] }
  0xc9   :  { %2505 = vmatpush.bf16.msrb.mxu1 %v3852_v62  ;;  %v2287_v24 = vadd.f32 %v2286_v21, %v4058_v49  ;;  %v2299_v25 = vpop.f32.mrf.mxu1  ;;  %v3939_v62 = vld [vmem:[#allocation5 + $0x7f8] sm:$0xff] }
  0xca   :  { %2518 = vmatpush.bf16.msrb.mxu2 %v3860_v1  ;;  %v650_v1 = vpack.c.b16 %v618_v57, %v618_v57  ;;  %v3927_v21 = vld [vmem:[#allocation5 + $0x798] sm:$0xff] }
  0xcb   :  { %2531 = vmatpush.bf16.msrb.mxu3 %v3868_v2  ;;  %2493 = vmatmul.bf16.vlgmr.msrb.gmra.mxu0 %v645_v9  ;;  %v2300_v28 = vadd.f32 %v2299_v25, %v2287_v24  ;;  %v652_v2 = vpack.c.b16 %v620_v58, %v620_v58  ;;  %v3929_v9 = vld [vmem:[#allocation5 + $0x7a8] sm:$0xff] }
  0xcc   :  { %2537 = vmatpush.bf16.msra.mxu0 %v3883_v5  ;;  %2506 = vmatmul.bf16.vlgmr.msrb.gmra.mxu1 %v646_v11  ;;  %v3930_v5 = vld [vmem:[#allocation5 + $0x7b0] sm:$0xff] }
  0xcd   :  { %2550 = vmatpush.bf16.msra.mxu1 %v3891_v6  ;;  %2519 = vmatmul.bf16.vlgmr.msrb.gmra.mxu2 %v647_v10  ;;  %v3938_v6 = vld [vmem:[#allocation5 + $0x7f0] sm:$0xff]  ;;  %v3937_v10 = vld [vmem:[#allocation5 + $0x7e8] sm:$0xff] }
  0xce   :  { %2563 = vmatpush.bf16.msra.mxu2 %v3899_v7  ;;  %2532 = vmatmul.bf16.vlgmr.msrb.gmra.mxu3 %v648_v12  ;;  %v3913_v7 = vld [vmem:[#allocation5 + $0x728] sm:$0xff] }
  0xcf   :  { %2576 = vmatpush.bf16.msra.mxu3 %v3907_v8  ;;  %v3921_v8 = vld [vmem:[#allocation5 + $0x768] sm:$0xff] }
  0xd0   :  { %2538 = vmatpush.bf16.msra.mxu0 %v3882_v13  ;;  %v2312_v33 = vpop.f32.mrf.mxu2  ;;  %v2288_v36 = vpop.f32.mrf.mxu0  ;;  %v3912_v13 = vld [vmem:[#allocation5 + $0x720] sm:$0xff] }
  0xd1   :  { %2551 = vmatpush.bf16.msra.mxu1 %v3890_v14  ;;  %v2313_v34 = vadd.f32 %v2312_v33, %v2300_v28  ;;  %v2325_v35 = vpop.f32.mrf.mxu3  ;;  %v2301_v40 = vpop.f32.mrf.mxu1  ;;  %v3920_v14 = vld [vmem:[#allocation5 + $0x760] sm:$0xff]  ;;  %v3910_v28 = vld [vmem:[#allocation5 + $0x710] sm:$0xff]  ;;  %v3909_v33 = vld [vmem:[#allocation5 + $0x708] sm:$0xff] }
  0xd2   :  { %2564 = vmatpush.bf16.msra.mxu2 %v3898_v15  ;;  %v3925_v36 = vld [vmem:[#allocation5 + $0x788] sm:$0xff] }
  0xd3   :  { %2577 = vmatpush.bf16.msra.mxu3 %v3906_v16  ;;  %v4061_v39 = vadd.f32 %v2325_v35, %v2313_v34  ;;  %v3928_v16 = vld [vmem:[#allocation5 + $0x7a0] sm:$0xff]  ;;  %v3917_v34 = vld [vmem:[#allocation5 + $0x748] sm:$0xff]  ;;  %v59_v35 = vld [vmem:[#allocation2 + $0x70] sm:$0xff] }
  0xd4   :  { %2539 = vmatpush.bf16.msra.mxu0 %v3881_v17  ;;  %v3936_v17 = vld [vmem:[#allocation5 + $0x7e0] sm:$0xff] }
  0xd5   :  { %2552 = vmatpush.bf16.msra.mxu1 %v3889_v18 }
  0xd6   :  { %2565 = vmatpush.bf16.msra.mxu2 %v3897_v19  ;;  %v3911_v19 = vld [vmem:[#allocation5 + $0x718] sm:$0xff] }
  0xd7   :  { %2578 = vmatpush.bf16.msra.mxu3 %v3905_v20  ;;  %v3919_v20 = vld [vmem:[#allocation5 + $0x758] sm:$0xff] }
  0xd8   :  { %2540 = vmatpush.bf16.msra.mxu0 %v3880_v22  ;;  %v2314_v49 = vpop.f32.mrf.mxu2  ;;  %v3935_v22 = vld [vmem:[#allocation5 + $0x7d8] sm:$0xff] }
  0xd9   :  { %2553 = vmatpush.bf16.msra.mxu1 %v3888_v23  ;;  %v2327_v50 = vpop.f32.mrf.mxu3 }
  0xda   :  { %2566 = vmatpush.bf16.msra.mxu2 %v3896_v26 }
  0xdb   :  { %2579 = vmatpush.bf16.msra.mxu3 %v3904_v27 }
  0xdc   :  { %2541 = vmatpush.bf16.msra.mxu0 %v3879_v29  ;;  %v3918_v29 = vld [vmem:[#allocation5 + $0x750] sm:$0xff] }
  0xdd   :  { %2554 = vmatpush.bf16.msra.mxu1 %v3887_v30 }
  0xde   :  { %2567 = vmatpush.bf16.msra.mxu2 %v3895_v31  ;;  %v3926_v31 = vld [vmem:[#allocation5 + $0x790] sm:$0xff] }
  0xdf   :  { %2580 = vmatpush.bf16.msra.mxu3 %v3903_v32  ;;  %v3934_v32 = vld [vmem:[#allocation5 + $0x7d0] sm:$0xff] }
  0xe0   :  { %2542 = vmatpush.bf16.msra.mxu0 %v3878_v37  ;;  %v3933_v37 = vld [vmem:[#allocation5 + $0x7c8] sm:$0xff] }
  0xe1   :  { %2555 = vmatpush.bf16.msra.mxu1 %v3886_v38  ;;  %v60_v38 = vld [vmem:[#allocation2 + $0x78] sm:$0xff] }
  0xe2   :  { %2568 = vmatpush.bf16.msra.mxu2 %v3894_v41  ;;  %v621_v41 = vunpack.c.l.b16 %v59_v35 }
  0xe3   :  { %2581 = vmatpush.bf16.msra.mxu3 %v3902_v42  ;;  %v622_v42 = vunpack.c.h.b16 %v59_v35 }
  0xe4   :  { %2543 = vmatpush.bf16.msra.mxu0 %v3877_v43  ;;  %v3908_v43 = vld [vmem:[#allocation5 + $0x700] sm:$0xff]  ;;  %v653_v49 = vpack.c.b16 %v621_v41, %v621_v41 }
  0xe5   :  { %2556 = vmatpush.bf16.msra.mxu1 %v3885_v44  ;;  %v3916_v44 = vld [vmem:[#allocation5 + $0x740] sm:$0xff]  ;;  %v654_v50 = vpack.c.b16 %v622_v42, %v622_v42 }
  0xe6   :  { %2569 = vmatpush.bf16.msra.mxu2 %v3893_v45  ;;  %v623_v45 = vunpack.c.l.b16 %v60_v38 }
  0xe7   :  { %2582 = vmatpush.bf16.msra.mxu3 %v3901_v46  ;;  %v624_v46 = vunpack.c.h.b16 %v60_v38 }
  0xe8   :  { %2544 = vmatpush.bf16.msra.mxu0 %v3876_v51  ;;  %v2338_v11 = vpop.f32.mrf.mxu0  ;;  %v655_v51 = vpack.c.b16 %v623_v45, %v623_v45 }
  0xe9   :  { %2557 = vmatpush.bf16.msra.mxu1 %v3884_v52  ;;  %v2339_v12 = vadd.f32 %v2338_v11, %v4061_v39  ;;  %v2351_v15 = vpop.f32.mrf.mxu1  ;;  %v656_v52 = vpack.c.b16 %v624_v46, %v624_v46 }
  0xea   :  { %2570 = vmatpush.bf16.msra.mxu2 %v3892_v55 }
  0xeb   :  { %2583 = vmatpush.bf16.msra.mxu3 %v3900_v56  ;;  %2545 = vmatmul.bf16.vlgmr.msra.gmra.mxu0 %v649_v63  ;;  %v2352_v18 = vadd.f32 %v2351_v15, %v2339_v12 }
  0xec   :  { %2589 = vmatpush.bf16.msrb.mxu0 %v3915_v59  ;;  %2558 = vmatmul.bf16.vlgmr.msra.gmra.mxu1 %v650_v1 }
  0xed   :  { %2602 = vmatpush.bf16.msrb.mxu1 %v3923_v60  ;;  %2571 = vmatmul.bf16.vlgmr.msra.gmra.mxu2 %v651_v0 }
  0xee   :  { %2615 = vmatpush.bf16.msrb.mxu2 %v3931_v61  ;;  %2584 = vmatmul.bf16.vlgmr.msra.gmra.mxu3 %v652_v2 }
  0xef   :  { %2628 = vmatpush.bf16.msrb.mxu3 %v3939_v62 }
  0xf0   :  { %2590 = vmatpush.bf16.msrb.mxu0 %v3914_v3  ;;  %v2364_v23 = vpop.f32.mrf.mxu2  ;;  %v2340_v26 = vpop.f32.mrf.mxu0 }
  0xf1   :  { %2603 = vmatpush.bf16.msrb.mxu1 %v3922_v4  ;;  %v2365_v24 = vadd.f32 %v2364_v23, %v2352_v18  ;;  %v2377_v25 = vpop.f32.mrf.mxu3  ;;  %v2353_v30 = vpop.f32.mrf.mxu1 }
  0xf2   :  { %2616 = vmatpush.bf16.msrb.mxu2 %v3930_v5 }
  0xf3   :  { %2629 = vmatpush.bf16.msrb.mxu3 %v3938_v6  ;;  %v2378_v27 = vadd.f32 %v2377_v25, %v2365_v24 }
  0xf4   :  { %2591 = vmatpush.bf16.msrb.mxu0 %v3913_v7 }
  0xf5   :  { %2604 = vmatpush.bf16.msrb.mxu1 %v3921_v8 }
  0xf6   :  { %2617 = vmatpush.bf16.msrb.mxu2 %v3929_v9 }
  0xf7   :  { %2630 = vmatpush.bf16.msrb.mxu3 %v3937_v10 }
  0xf8   :  { %2592 = vmatpush.bf16.msrb.mxu0 %v3912_v13  ;;  %v2366_v39 = vpop.f32.mrf.mxu2 }
  0xf9   :  { %2605 = vmatpush.bf16.msrb.mxu1 %v3920_v14  ;;  %v2379_v40 = vpop.f32.mrf.mxu3 }
  0xfa   :  { %2618 = vmatpush.bf16.msrb.mxu2 %v3928_v16 }
  0xfb   :  { %2631 = vmatpush.bf16.msrb.mxu3 %v3936_v17 }
  0xfc   :  { %2593 = vmatpush.bf16.msrb.mxu0 %v3911_v19 }
  0xfd   :  { %2606 = vmatpush.bf16.msrb.mxu1 %v3919_v20 }
  0xfe   :  { %2619 = vmatpush.bf16.msrb.mxu2 %v3927_v21 }
  0xff   :  { %2632 = vmatpush.bf16.msrb.mxu3 %v3935_v22 }
 0x100   :  { %2594 = vmatpush.bf16.msrb.mxu0 %v3910_v28 }
 0x101   :  { %2607 = vmatpush.bf16.msrb.mxu1 %v3918_v29 }
 0x102   :  { %2620 = vmatpush.bf16.msrb.mxu2 %v3926_v31 }
 0x103   :  { %2633 = vmatpush.bf16.msrb.mxu3 %v3934_v32 }
 0x104   :  { %2595 = vmatpush.bf16.msrb.mxu0 %v3909_v33 }
 0x105   :  { %2608 = vmatpush.bf16.msrb.mxu1 %v3917_v34 }
 0x106   :  { %2621 = vmatpush.bf16.msrb.mxu2 %v3925_v36 }
 0x107   :  { %2634 = vmatpush.bf16.msrb.mxu3 %v3933_v37 }
 0x108   :  { %2596 = vmatpush.bf16.msrb.mxu0 %v3908_v43  ;;  %v2390_v53 = vpop.f32.mrf.mxu0 }
 0x109   :  { %2609 = vmatpush.bf16.msrb.mxu1 %v3916_v44  ;;  %v2391_v54 = vadd.f32 %v2390_v53, %v2378_v27  ;;  %v2403_v55 = vpop.f32.mrf.mxu1 }
 0x10a   :  { %2622 = vmatpush.bf16.msrb.mxu2 %v3924_v47 }
 0x10b   :  { %2635 = vmatpush.bf16.msrb.mxu3 %v3932_v48  ;;  %2597 = vmatmul.bf16.vlgmr.msrb.gmra.mxu0 %v653_v49  ;;  %v2404_v56 = vadd.f32 %v2403_v55, %v2391_v54 }
 0x10c   :  { %2610 = vmatmul.bf16.vlgmr.msrb.gmra.mxu1 %v654_v50 }
 0x10d   :  { %2623 = vmatmul.bf16.vlgmr.msrb.gmra.mxu2 %v655_v51 }
 0x10e   :  { %2636 = vmatmul.bf16.vlgmr.msrb.gmra.mxu3 %v656_v52 }
 0x110   :  { %v2416_v57 = vpop.f32.mrf.mxu2  ;;  %v2392_v60 = vpop.f32.mrf.mxu0 }
 0x111   :  { %v2417_v58 = vadd.f32 %v2416_v57, %v2404_v56  ;;  %v2429_v59 = vpop.f32.mrf.mxu3  ;;  %v2405_v62 = vpop.f32.mrf.mxu1 }
 0x113   :  { %v2430_v61 = vadd.f32 %v2429_v59, %v2417_v58 }
 0x118   :  { %v2418_v63 = vpop.f32.mrf.mxu2 }
 0x119   :  { %v2431_v0 = vpop.f32.mrf.mxu3 }
 0x128   :  { %v2442_v1 = vpop.f32.mrf.mxu0 }
 0x129   :  { %v2443_v2 = vadd.f32 %v2442_v1, %v2430_v61  ;;  %v2455_v3 = vpop.f32.mrf.mxu1 }
 0x12b   :  { %v2456_v4 = vadd.f32 %v2455_v3, %v2443_v2 }
 0x130   :  { %v2468_v5 = vpop.f32.mrf.mxu2  ;;  %v2444_v8 = vpop.f32.mrf.mxu0 }
 0x131   :  { %v2469_v6 = vadd.f32 %v2468_v5, %v2456_v4  ;;  %v2481_v7 = vpop.f32.mrf.mxu3  ;;  %v2457_v10 = vpop.f32.mrf.mxu1 }
 0x133   :  { %v2482_v9 = vadd.f32 %v2481_v7, %v2469_v6 }
 0x138   :  { %v2470_v11 = vpop.f32.mrf.mxu2 }
 0x139   :  { %v2483_v12 = vpop.f32.mrf.mxu3 }
 0x148   :  { %v2494_v13 = vpop.f32.mrf.mxu0 }
 0x149   :  { %v2507_v14 = vpop.f32.mrf.mxu1  ;;  %v2495_v24 = vadd.f32 %v2494_v13, %v2482_v9 }
 0x14b   :  { %v2508_v28 = vadd.f32 %v2507_v14, %v2495_v24 }
 0x150   :  { %v2520_v15 = vpop.f32.mrf.mxu2  ;;  %v2496_v17 = vpop.f32.mrf.mxu0 }
 0x151   :  { %v2533_v16 = vpop.f32.mrf.mxu3  ;;  %v2509_v18 = vpop.f32.mrf.mxu1  ;;  %v2521_v29 = vadd.f32 %v2520_v15, %v2508_v28 }
 0x153   :  { %v2534_v32 = vadd.f32 %v2533_v16, %v2521_v29 }
 0x158   :  { %v2522_v19 = vpop.f32.mrf.mxu2 }
 0x159   :  { %v2535_v20 = vpop.f32.mrf.mxu3 }
 0x168   :  { %v2546_v21 = vpop.f32.mrf.mxu0 }
 0x169   :  { %v2559_v22 = vpop.f32.mrf.mxu1  ;;  %v2547_v33 = vadd.f32 %v2546_v21, %v2534_v32 }
 0x16b   :  { %v2560_v34 = vadd.f32 %v2559_v22, %v2547_v33 }
 0x170   :  { %v2572_v23 = vpop.f32.mrf.mxu2  ;;  %v2548_v26 = vpop.f32.mrf.mxu0 }
 0x171   :  { %v2585_v25 = vpop.f32.mrf.mxu3  ;;  %v2561_v27 = vpop.f32.mrf.mxu1  ;;  %v2573_v35 = vadd.f32 %v2572_v23, %v2560_v34 }
 0x173   :  { %v2586_v36 = vadd.f32 %v2585_v25, %v2573_v35 }
 0x178   :  { %v2574_v30 = vpop.f32.mrf.mxu2 }
 0x179   :  { %v2587_v31 = vpop.f32.mrf.mxu3 }
 0x188   :  { %v2598_v37 = vpop.f32.mrf.mxu0 }
 0x189   :  { %v2611_v38 = vpop.f32.mrf.mxu1  ;;  %v2599_v39 = vadd.f32 %v2598_v37, %v2586_v36 }
 0x18b   :  { %v2612_v40 = vadd.f32 %v2611_v38, %v2599_v39 }
 0x190   :  { %v2624_v41 = vpop.f32.mrf.mxu2  ;;  %v2600_v44 = vpop.f32.mrf.mxu0 }
 0x191   :  { %v2637_v42 = vpop.f32.mrf.mxu3  ;;  %v2625_v43 = vadd.f32 %v2624_v41, %v2612_v40  ;;  %v2613_v45 = vpop.f32.mrf.mxu1 }
 0x193   :  { %v2638_v46 = vadd.f32 %v2637_v42, %v2625_v43 }
 0x195   :  { %2641 = vst [vmem:[#allocation7] sm:$0xff] %v2638_v46 }
 0x196   :  { %2652 = dma.vmem_to_hbm [thread:$0]  %s2648_s24, 128, %s2650_s27, [#allocation4]  }
 0x198   :  { %v2626_v47 = vpop.f32.mrf.mxu2 }
 0x199   :  { %v2639_v48 = vpop.f32.mrf.mxu3 }
 0x19a   :  { %4022 = dma.done.wait [#allocation4], 128  }
 0x19b   :  { %4023 = vsyncadd [#allocation4], 4294967168 }
 0x19c   :  { %2657 = vsyncpa [#allocation3], 1 }
 0x19d   :  { %2658 = vsyncpa [#allocation6], 1 }
 0x19e   :  { %2659 = vsyncpa [#allocation4], 1 }

</bundles_post_ra>
